<compile_context>
chip_gen: v6e
topology: v6e:2x2x1
jax: 0.10.0
libtpu: 0.0.40
codegen_flags: <defaults>
</compile_context>

<pallas_src>
import jax
import jax.numpy as jnp
from jax.experimental import pallas as pl
from jax.experimental.pallas import tpu as pltpu


def _multi_modal_kernel(fea1_ref, fea2_ref, fea3_ref, pred_ref,
                        w_dd_ref, w_cd_ref, b_ref, out_ref):
    """One row-tile of the fused forward pass.

    w_dd_ref : (6, D, D) f32  [sa1_wa, sa2_wa, l1_w, l2_w, g_wa, g_wb]
    w_cd_ref : (2, C, D) f32  [proj_w @ sa1_wb, proj_w @ sa2_wb]  (proj folded)
    b_ref    : (5, 1, D) f32  [sa1_b, sa2_b, l1_b, l2_b, g_b]
    """
    f32 = jnp.float32

    f1 = fea1_ref[...].astype(f32)
    f2 = fea2_ref[...].astype(f32)
    f3 = fea3_ref[...].astype(f32)

    # ---- softmax over the class dimension (dim=2 in the torch module) ----
    logits = pred_ref[...].astype(f32)
    m = jnp.max(logits, axis=-1, keepdims=True)
    e = jnp.exp(logits - m)
    prob = e * pl.reciprocal(jnp.sum(e, axis=-1, keepdims=True), approx=True)

    # ---- unpack resident weights (static leading-axis indexing: cheap) ----
    sa1_wa = w_dd_ref[0]
    sa2_wa = w_dd_ref[1]
    l1_w = w_dd_ref[2]
    l2_w = w_dd_ref[3]
    g_wa = w_dd_ref[4]
    g_wb = w_dd_ref[5]
    sa1_wp = w_cd_ref[0]
    sa2_wp = w_cd_ref[1]
    sa1_b = b_ref[0]
    sa2_b = b_ref[1]
    l1_b = b_ref[2]
    l2_b = b_ref[3]
    g_b = b_ref[4]

    # ---- attention_map_1 = sigmoid(SA1(cat(fea2, Embedding)));  proj folded ----
    att1 = jax.nn.sigmoid(
        jnp.dot(f2, sa1_wa, preferred_element_type=f32)
        + jnp.dot(prob, sa1_wp, preferred_element_type=f32)
        + sa1_b)

    # ---- attention_map_2 = sigmoid(SA2(cat(fea3, Embedding))) ----
    att2 = jax.nn.sigmoid(
        jnp.dot(f3, sa2_wa, preferred_element_type=f32)
        + jnp.dot(prob, sa2_wp, preferred_element_type=f32)
        + sa2_b)

    # ---- Complementary_features = att1*Linear1(fea2) + att2*Linear2(fea3) ----
    lin1 = jnp.dot(f2, l1_w, preferred_element_type=f32) + l1_b
    lin2 = jnp.dot(f3, l2_w, preferred_element_type=f32) + l2_b
    comp = att1 * lin1 + att2 * lin2

    # ---- GatedBimodal(fea1, comp):  z*tanh(fea1) + (1-z)*tanh(comp) ----
    z = jax.nn.sigmoid(
        jnp.dot(f1, g_wa, preferred_element_type=f32)
        + jnp.dot(comp, g_wb, preferred_element_type=f32)
        + g_b)
    out = z * jnp.tanh(f1) + (1.0 - z) * jnp.tanh(comp)
    out_ref[...] = out.astype(out_ref.dtype)


def _choose_tile_m(M, cap=1024):
    """Row-tile size: multiple of 8, <= cap, aiming for >= 2 grid steps."""
    target = max(8, min(cap, -(-M // 2)))   # ~ceil(M/2), capped
    tile = -(-target // 8) * 8              # round up to sublane multiple
    full = -(-M // 8) * 8                   # M rounded up to multiple of 8
    return min(tile, full)


def multi_modal_forward(fea1, fea2, fea3, pred, params, *, tile_m=None,
                        act_dtype=jnp.bfloat16):
    """fea*: (B, T, D); pred: (B, T, C).  Returns (B, T, D) in act_dtype."""
    B, T, D = fea1.shape
    C = pred.shape[-1]
    M = B * T
    if tile_m is None:
        tile_m = _choose_tile_m(M)
    grid_m = -(-M // tile_m)
    M_pad = grid_m * tile_m

    f32 = jnp.float32

    # bf16 activation I/O (compute stays f32 inside the kernel); pad rows so
    # any B*T works without shrinking the tile.
    def prep(x, F):
        x = x.reshape(M, F).astype(act_dtype)
        if M_pad != M:
            x = jnp.pad(x, ((0, M_pad - M), (0, 0)))
        return x

    fea1f = prep(fea1, D)
    fea2f = prep(fea2, D)
    fea3f = prep(fea3, D)
    predf = prep(pred, C)

    # Host-side weight prep: fold proj into the "embedding half" of each
    # selective-attention layer (exact algebra) and pack all params into
    # three stacked, grid-invariant operands.
    w_dd = jnp.stack([params["sa1_wa"], params["sa2_wa"],
                      params["l1_w"], params["l2_w"],
                      params["g_wa"], params["g_wb"]], axis=0).astype(f32)
    w_cd = jnp.stack([params["proj_w"] @ params["sa1_wb"],
                      params["proj_w"] @ params["sa2_wb"]], axis=0).astype(f32)
    b = jnp.stack([params["sa1_b"], params["sa2_b"],
                   params["l1_b"], params["l2_b"],
                   params["g_b"]], axis=0).astype(f32)

    row_d = pl.BlockSpec((tile_m, D), lambda i: (i, 0))
    row_c = pl.BlockSpec((tile_m, C), lambda i: (i, 0))
    w_dd_spec = pl.BlockSpec(w_dd.shape, lambda i: (0, 0, 0))
    w_cd_spec = pl.BlockSpec(w_cd.shape, lambda i: (0, 0, 0))
    b_spec = pl.BlockSpec(b.shape, lambda i: (0, 0, 0))

    out = pl.pallas_call(
        _multi_modal_kernel,
        out_shape=jax.ShapeDtypeStruct((M_pad, D), act_dtype),
        grid_spec=pltpu.PrefetchScalarGridSpec(
            num_scalar_prefetch=0,
            grid=(grid_m,),
            in_specs=[row_d, row_d, row_d, row_c,
                      w_dd_spec, w_cd_spec, b_spec],
            out_specs=row_d,
        ),
        compiler_params=pltpu.CompilerParams(
            dimension_semantics=("parallel",)),
    )(fea1f, fea2f, fea3f, predf, w_dd, w_cd, b)

    if M_pad != M:
        out = out[:M]
    return out.reshape(B, T, D)


def init_params(key, D, C):
    """Deterministic synthetic parameters (torch nn.Linear-style, transposed).

    torch nn.Linear(in, out) has weight (out, in); we store the transpose
    (in, out) so y = x @ W + b.  Concatenated-input layers (in = 2*D) are
    split into W_a (first D input rows) and W_b (last D rows).
    """
    ks = jax.random.split(key, 12)
    f32 = jnp.float32

    def u(k, shape, fan_in):
        bound = 1.0 / jnp.sqrt(fan_in)
        return jax.random.uniform(k, shape, f32, -bound, bound)

    params = {}
    # proj: Linear(C -> D, bias=False); stored (C, D)
    params["proj_w"] = u(ks[0], (C, D), C)
    # Selective_attention_1/2: Linear(2D -> D, bias=True); split into two (D, D)
    params["sa1_wa"] = u(ks[1], (D, D), 2 * D)
    params["sa1_wb"] = u(ks[2], (D, D), 2 * D)
    params["sa1_b"] = u(ks[3], (1, D), 2 * D)
    params["sa2_wa"] = u(ks[4], (D, D), 2 * D)
    params["sa2_wb"] = u(ks[5], (D, D), 2 * D)
    params["sa2_b"] = u(ks[6], (1, D), 2 * D)
    # Linear1/Linear2: Linear(D -> D, bias=True)
    params["l1_w"] = u(ks[7], (D, D), D)
    params["l1_b"] = u(ks[8], (1, D), D)
    params["l2_w"] = u(ks[9], (D, D), D)
    params["l2_b"] = u(ks[10], (1, D), D)
    # Gate.W: Linear(2D -> D, bias=True)
    kg = jax.random.split(ks[11], 3)
    params["g_wa"] = u(kg[0], (D, D), 2 * D)
    params["g_wb"] = u(kg[1], (D, D), 2 * D)
    params["g_b"] = u(kg[2], (1, D), 2 * D)
    return params


def reference_forward(fea1, fea2, fea3, pred, p):
    """Pure-JAX mirror of the torch forward, for correctness check."""
    prob = jax.nn.softmax(pred.astype(jnp.float32), axis=2)
    emb = prob @ p["proj_w"]
    att1 = jax.nn.sigmoid(fea2 @ p["sa1_wa"] + emb @ p["sa1_wb"] + p["sa1_b"])
    att2 = jax.nn.sigmoid(fea3 @ p["sa2_wa"] + emb @ p["sa2_wb"] + p["sa2_b"])
    comp = att1 * (fea2 @ p["l1_w"] + p["l1_b"]) + att2 * (fea3 @ p["l2_w"] + p["l2_b"])
    z = jax.nn.sigmoid(fea1 @ p["g_wa"] + comp @ p["g_wb"] + p["g_b"])
    return z * jnp.tanh(fea1) + (1.0 - z) * jnp.tanh(comp)


if __name__ == "__main__":
    B, T = 2, 64         # batch, sequence length (M = 128 rows -> 2 grid steps)
    D = 32               # FeatureExtraction_output
    C = 16               # num_class

    key = jax.random.PRNGKey(0)
    k1, k2, k3, k4, kp = jax.random.split(key, 5)

    Iter_fea1 = jax.random.normal(k1, (B, T, D), jnp.float32)
    Iter_fea2 = jax.random.normal(k2, (B, T, D), jnp.float32)
    Iter_fea3 = jax.random.normal(k3, (B, T, D), jnp.float32)
    Iter_pred1 = jax.random.normal(k4, (B, T, C), jnp.float32)

    params = init_params(kp, D, C)

    out = multi_modal_forward(Iter_fea1, Iter_fea2, Iter_fea3, Iter_pred1, params)
    out = jax.block_until_ready(out)

    # Reference on the same bf16-rounded activations the kernel consumed.
    rd = lambda x: x.astype(jnp.bfloat16).astype(jnp.float32)
    ref = reference_forward(rd(Iter_fea1), rd(Iter_fea2), rd(Iter_fea3),
                            rd(Iter_pred1), params)

    assert out.shape == (B, T, D)
    assert jnp.allclose(out.astype(jnp.float32), ref, atol=3e-2, rtol=3e-2), \
        "mismatch vs reference"

    print("KERNEL_OK")
</pallas_src>

<mosaic_0001>
module attributes {stable_mosaic.version = 11 : i64} {
  func.func @_multi_modal_kernel(%arg0: i32, %arg1: memref<64x32xbf16, #tpu.memory_space<vmem>>, %arg2: memref<64x32xbf16, #tpu.memory_space<vmem>>, %arg3: memref<64x32xbf16, #tpu.memory_space<vmem>>, %arg4: memref<64x16xbf16, #tpu.memory_space<vmem>>, %arg5: memref<6x32x32xf32, #tpu.memory_space<vmem>>, %arg6: memref<2x16x32xf32, #tpu.memory_space<vmem>>, %arg7: memref<5x1x32xf32, #tpu.memory_space<vmem>>, %arg8: memref<64x32xbf16, #tpu.memory_space<vmem>>) attributes {dimension_semantics = [#tpu.dimension_semantics<parallel>], iteration_bounds = array<i64: 2>, scalar_prefetch = 0 : i64, scratch_operands = 0 : i64, tpu.core_type = #tpu.core_type<tc>, window_params = [{transform_indices = @transform_0, window_bounds = array<i64: 64, 32>}, {transform_indices = @transform_1, window_bounds = array<i64: 64, 32>}, {transform_indices = @transform_2, window_bounds = array<i64: 64, 32>}, {transform_indices = @transform_3, window_bounds = array<i64: 64, 16>}, {pipeline_mode = #tpu.pipeline_mode<synchronous>, transform_indices = @transform_4, window_bounds = array<i64: 6, 32, 32>}, {pipeline_mode = #tpu.pipeline_mode<synchronous>, transform_indices = @transform_5, window_bounds = array<i64: 2, 16, 32>}, {pipeline_mode = #tpu.pipeline_mode<synchronous>, transform_indices = @transform_6, window_bounds = array<i64: 5, 1, 32>}, {transform_indices = @transform_7, window_bounds = array<i64: 64, 32>}]} {
    %c0 = arith.constant 0 : index
    %c0_0 = arith.constant 0 : index
    %0 = vector.load %arg1[%c0, %c0_0] : memref<64x32xbf16, #tpu.memory_space<vmem>>, vector<64x32xbf16>
    %1 = arith.extf %0 : vector<64x32xbf16> to vector<64x32xf32>
    %c0_1 = arith.constant 0 : index
    %c0_2 = arith.constant 0 : index
    %2 = vector.load %arg2[%c0_1, %c0_2] : memref<64x32xbf16, #tpu.memory_space<vmem>>, vector<64x32xbf16>
    %3 = arith.extf %2 : vector<64x32xbf16> to vector<64x32xf32>
    %c0_3 = arith.constant 0 : index
    %c0_4 = arith.constant 0 : index
    %4 = vector.load %arg3[%c0_3, %c0_4] : memref<64x32xbf16, #tpu.memory_space<vmem>>, vector<64x32xbf16>
    %5 = arith.extf %4 : vector<64x32xbf16> to vector<64x32xf32>
    %c0_5 = arith.constant 0 : index
    %c0_6 = arith.constant 0 : index
    %6 = vector.load %arg4[%c0_5, %c0_6] : memref<64x16xbf16, #tpu.memory_space<vmem>>, vector<64x16xbf16>
    %7 = arith.extf %6 : vector<64x16xbf16> to vector<64x16xf32>
    %cst = arith.constant dense<0xFF800000> : vector<64xf32>
    %8 = vector.multi_reduction <maximumf>, %7, %cst [1] : vector<64x16xf32> to vector<64xf32>
    %9 = vector.shape_cast %8 : vector<64xf32> to vector<64x1xf32>
    %10 = vector.broadcast %9 : vector<64x1xf32> to vector<64x16xf32>
    %11 = arith.subf %7, %10 : vector<64x16xf32>
    %12 = math.exp %11 : vector<64x16xf32>
    %cst_7 = arith.constant dense<0.000000e+00> : vector<64xf32>
    %13 = vector.multi_reduction <add>, %12, %cst_7 [1] : vector<64x16xf32> to vector<64xf32>
    %14 = vector.shape_cast %13 : vector<64xf32> to vector<64x1xf32>
    %15 = tpu.reciprocal %14 {approx = true} : vector<64x1xf32> -> vector<64x1xf32>
    %16 = vector.broadcast %15 : vector<64x1xf32> to vector<64x16xf32>
    %17 = arith.mulf %12, %16 : vector<64x16xf32>
    %c0_8 = arith.constant 0 : index
    %c0_9 = arith.constant 0 : index
    %c0_10 = arith.constant 0 : index
    %18 = vector.load %arg5[%c0_8, %c0_9, %c0_10] : memref<6x32x32xf32, #tpu.memory_space<vmem>>, vector<1x32x32xf32>
    %19 = vector.shape_cast %18 : vector<1x32x32xf32> to vector<32x32xf32>
    %c1 = arith.constant 1 : index
    %c0_11 = arith.constant 0 : index
    %c0_12 = arith.constant 0 : index
    %20 = vector.load %arg5[%c1, %c0_11, %c0_12] : memref<6x32x32xf32, #tpu.memory_space<vmem>>, vector<1x32x32xf32>
    %21 = vector.shape_cast %20 : vector<1x32x32xf32> to vector<32x32xf32>
    %c2 = arith.constant 2 : index
    %c0_13 = arith.constant 0 : index
    %c0_14 = arith.constant 0 : index
    %22 = vector.load %arg5[%c2, %c0_13, %c0_14] : memref<6x32x32xf32, #tpu.memory_space<vmem>>, vector<1x32x32xf32>
    %23 = vector.shape_cast %22 : vector<1x32x32xf32> to vector<32x32xf32>
    %c3 = arith.constant 3 : index
    %c0_15 = arith.constant 0 : index
    %c0_16 = arith.constant 0 : index
    %24 = vector.load %arg5[%c3, %c0_15, %c0_16] : memref<6x32x32xf32, #tpu.memory_space<vmem>>, vector<1x32x32xf32>
    %25 = vector.shape_cast %24 : vector<1x32x32xf32> to vector<32x32xf32>
    %c4 = arith.constant 4 : index
    %c0_17 = arith.constant 0 : index
    %c0_18 = arith.constant 0 : index
    %26 = vector.load %arg5[%c4, %c0_17, %c0_18] : memref<6x32x32xf32, #tpu.memory_space<vmem>>, vector<1x32x32xf32>
    %27 = vector.shape_cast %26 : vector<1x32x32xf32> to vector<32x32xf32>
    %c5 = arith.constant 5 : index
    %c0_19 = arith.constant 0 : index
    %c0_20 = arith.constant 0 : index
    %28 = vector.load %arg5[%c5, %c0_19, %c0_20] : memref<6x32x32xf32, #tpu.memory_space<vmem>>, vector<1x32x32xf32>
    %29 = vector.shape_cast %28 : vector<1x32x32xf32> to vector<32x32xf32>
    %c0_21 = arith.constant 0 : index
    %c0_22 = arith.constant 0 : index
    %c0_23 = arith.constant 0 : index
    %30 = vector.load %arg6[%c0_21, %c0_22, %c0_23] : memref<2x16x32xf32, #tpu.memory_space<vmem>>, vector<1x16x32xf32>
    %31 = vector.shape_cast %30 : vector<1x16x32xf32> to vector<16x32xf32>
    %c1_24 = arith.constant 1 : index
    %c0_25 = arith.constant 0 : index
    %c0_26 = arith.constant 0 : index
    %32 = vector.load %arg6[%c1_24, %c0_25, %c0_26] : memref<2x16x32xf32, #tpu.memory_space<vmem>>, vector<1x16x32xf32>
    %33 = vector.shape_cast %32 : vector<1x16x32xf32> to vector<16x32xf32>
    %c0_27 = arith.constant 0 : index
    %c0_28 = arith.constant 0 : index
    %c0_29 = arith.constant 0 : index
    %34 = vector.load %arg7[%c0_27, %c0_28, %c0_29] : memref<5x1x32xf32, #tpu.memory_space<vmem>>, vector<1x1x32xf32>
    %35 = vector.shape_cast %34 : vector<1x1x32xf32> to vector<1x32xf32>
    %c1_30 = arith.constant 1 : index
    %c0_31 = arith.constant 0 : index
    %c0_32 = arith.constant 0 : index
    %36 = vector.load %arg7[%c1_30, %c0_31, %c0_32] : memref<5x1x32xf32, #tpu.memory_space<vmem>>, vector<1x1x32xf32>
    %37 = vector.shape_cast %36 : vector<1x1x32xf32> to vector<1x32xf32>
    %c2_33 = arith.constant 2 : index
    %c0_34 = arith.constant 0 : index
    %c0_35 = arith.constant 0 : index
    %38 = vector.load %arg7[%c2_33, %c0_34, %c0_35] : memref<5x1x32xf32, #tpu.memory_space<vmem>>, vector<1x1x32xf32>
    %39 = vector.shape_cast %38 : vector<1x1x32xf32> to vector<1x32xf32>
    %c3_36 = arith.constant 3 : index
    %c0_37 = arith.constant 0 : index
    %c0_38 = arith.constant 0 : index
    %40 = vector.load %arg7[%c3_36, %c0_37, %c0_38] : memref<5x1x32xf32, #tpu.memory_space<vmem>>, vector<1x1x32xf32>
    %41 = vector.shape_cast %40 : vector<1x1x32xf32> to vector<1x32xf32>
    %c4_39 = arith.constant 4 : index
    %c0_40 = arith.constant 0 : index
    %c0_41 = arith.constant 0 : index
    %42 = vector.load %arg7[%c4_39, %c0_40, %c0_41] : memref<5x1x32xf32, #tpu.memory_space<vmem>>, vector<1x1x32xf32>
    %43 = vector.shape_cast %42 : vector<1x1x32xf32> to vector<1x32xf32>
    %cst_42 = arith.constant dense<0.000000e+00> : vector<64x32xf32>
    %44 = tpu.matmul %3, %19, %cst_42 {dimension_numbers = #tpu.dot_dimension_numbers<[1], [0], [0], [1], [0, 0, 1, 1], [], []>} : vector<64x32xf32>, vector<32x32xf32>, vector<64x32xf32> -> vector<64x32xf32>
    %cst_43 = arith.constant dense<0.000000e+00> : vector<64x32xf32>
    %45 = tpu.matmul %17, %31, %cst_43 {dimension_numbers = #tpu.dot_dimension_numbers<[1], [0], [0], [1], [0, 0, 1, 1], [], []>} : vector<64x16xf32>, vector<16x32xf32>, vector<64x32xf32> -> vector<64x32xf32>
    %46 = arith.addf %44, %45 : vector<64x32xf32>
    %47 = vector.broadcast %35 : vector<1x32xf32> to vector<64x32xf32>
    %48 = arith.addf %46, %47 : vector<64x32xf32>
    %49 = arith.negf %48 : vector<64x32xf32>
    %50 = math.exp %49 : vector<64x32xf32>
    %cst_44 = arith.constant 1.000000e+00 : f32
    %51 = vector.broadcast %cst_44 : f32 to vector<64x32xf32>
    %52 = arith.addf %51, %50 : vector<64x32xf32>
    %53 = arith.divf %51, %52 : vector<64x32xf32>
    %cst_45 = arith.constant dense<0.000000e+00> : vector<64x32xf32>
    %54 = tpu.matmul %5, %21, %cst_45 {dimension_numbers = #tpu.dot_dimension_numbers<[1], [0], [0], [1], [0, 0, 1, 1], [], []>} : vector<64x32xf32>, vector<32x32xf32>, vector<64x32xf32> -> vector<64x32xf32>
    %cst_46 = arith.constant dense<0.000000e+00> : vector<64x32xf32>
    %55 = tpu.matmul %17, %33, %cst_46 {dimension_numbers = #tpu.dot_dimension_numbers<[1], [0], [0], [1], [0, 0, 1, 1], [], []>} : vector<64x16xf32>, vector<16x32xf32>, vector<64x32xf32> -> vector<64x32xf32>
    %56 = arith.addf %54, %55 : vector<64x32xf32>
    %57 = vector.broadcast %37 : vector<1x32xf32> to vector<64x32xf32>
    %58 = arith.addf %56, %57 : vector<64x32xf32>
    %59 = arith.negf %58 : vector<64x32xf32>
    %60 = math.exp %59 : vector<64x32xf32>
    %cst_47 = arith.constant 1.000000e+00 : f32
    %61 = vector.broadcast %cst_47 : f32 to vector<64x32xf32>
    %62 = arith.addf %61, %60 : vector<64x32xf32>
    %63 = arith.divf %61, %62 : vector<64x32xf32>
    %cst_48 = arith.constant dense<0.000000e+00> : vector<64x32xf32>
    %64 = tpu.matmul %3, %23, %cst_48 {dimension_numbers = #tpu.dot_dimension_numbers<[1], [0], [0], [1], [0, 0, 1, 1], [], []>} : vector<64x32xf32>, vector<32x32xf32>, vector<64x32xf32> -> vector<64x32xf32>
    %65 = vector.broadcast %39 : vector<1x32xf32> to vector<64x32xf32>
    %66 = arith.addf %64, %65 : vector<64x32xf32>
    %cst_49 = arith.constant dense<0.000000e+00> : vector<64x32xf32>
    %67 = tpu.matmul %5, %25, %cst_49 {dimension_numbers = #tpu.dot_dimension_numbers<[1], [0], [0], [1], [0, 0, 1, 1], [], []>} : vector<64x32xf32>, vector<32x32xf32>, vector<64x32xf32> -> vector<64x32xf32>
    %68 = vector.broadcast %41 : vector<1x32xf32> to vector<64x32xf32>
    %69 = arith.addf %67, %68 : vector<64x32xf32>
    %70 = arith.mulf %53, %66 : vector<64x32xf32>
    %71 = arith.mulf %63, %69 : vector<64x32xf32>
    %72 = arith.addf %70, %71 : vector<64x32xf32>
    %cst_50 = arith.constant dense<0.000000e+00> : vector<64x32xf32>
    %73 = tpu.matmul %1, %27, %cst_50 {dimension_numbers = #tpu.dot_dimension_numbers<[1], [0], [0], [1], [0, 0, 1, 1], [], []>} : vector<64x32xf32>, vector<32x32xf32>, vector<64x32xf32> -> vector<64x32xf32>
    %cst_51 = arith.constant dense<0.000000e+00> : vector<64x32xf32>
    %74 = tpu.matmul %72, %29, %cst_51 {dimension_numbers = #tpu.dot_dimension_numbers<[1], [0], [0], [1], [0, 0, 1, 1], [], []>} : vector<64x32xf32>, vector<32x32xf32>, vector<64x32xf32> -> vector<64x32xf32>
    %75 = arith.addf %73, %74 : vector<64x32xf32>
    %76 = vector.broadcast %43 : vector<1x32xf32> to vector<64x32xf32>
    %77 = arith.addf %75, %76 : vector<64x32xf32>
    %78 = arith.negf %77 : vector<64x32xf32>
    %79 = math.exp %78 : vector<64x32xf32>
    %cst_52 = arith.constant 1.000000e+00 : f32
    %80 = vector.broadcast %cst_52 : f32 to vector<64x32xf32>
    %81 = arith.addf %80, %79 : vector<64x32xf32>
    %82 = arith.divf %80, %81 : vector<64x32xf32>
    %83 = math.tanh %1 : vector<64x32xf32>
    %84 = arith.mulf %82, %83 : vector<64x32xf32>
    %cst_53 = arith.constant 1.000000e+00 : f32
    %85 = vector.broadcast %cst_53 : f32 to vector<64x32xf32>
    %86 = arith.subf %85, %82 : vector<64x32xf32>
    %87 = math.tanh %72 : vector<64x32xf32>
    %88 = arith.mulf %86, %87 : vector<64x32xf32>
    %89 = arith.addf %84, %88 : vector<64x32xf32>
    %90 = arith.truncf %89 : vector<64x32xf32> to vector<64x32xbf16>
    %c0_54 = arith.constant 0 : index
    %c0_55 = arith.constant 0 : index
    %91 = vector.load %arg8[%c0_54, %c0_55] : memref<64x32xbf16, #tpu.memory_space<vmem>>, vector<64x32xbf16>
    tpu.vector_store %arg8[%c0_54, %c0_55], %90 {strides = array<i32>} : memref<64x32xbf16, #tpu.memory_space<vmem>>, vector<64x32xbf16>,
    return
  }
  func.func @transform_0(%arg0: i32) -> (i32, i32) {
    %c0_i32 = arith.constant 0 : i32
    %c0_i32_0 = arith.constant 0 : i32
    return %arg0, %c0_i32 : i32, i32
  }
  func.func @transform_1(%arg0: i32) -> (i32, i32) {
    %c0_i32 = arith.constant 0 : i32
    %c0_i32_0 = arith.constant 0 : i32
    return %arg0, %c0_i32 : i32, i32
  }
  func.func @transform_2(%arg0: i32) -> (i32, i32) {
    %c0_i32 = arith.constant 0 : i32
    %c0_i32_0 = arith.constant 0 : i32
    return %arg0, %c0_i32 : i32, i32
  }
  func.func @transform_3(%arg0: i32) -> (i32, i32) {
    %c0_i32 = arith.constant 0 : i32
    %c0_i32_0 = arith.constant 0 : i32
    return %arg0, %c0_i32 : i32, i32
  }
  func.func @transform_4(%arg0: i32) -> (i32, i32, i32) {
    %c0_i32 = arith.constant 0 : i32
    %c0_i32_0 = arith.constant 0 : i32
    %c0_i32_1 = arith.constant 0 : i32
    %c0_i32_2 = arith.constant 0 : i32
    return %c0_i32, %c0_i32_0, %c0_i32_1 : i32, i32, i32
  }
  func.func @transform_5(%arg0: i32) -> (i32, i32, i32) {
    %c0_i32 = arith.constant 0 : i32
    %c0_i32_0 = arith.constant 0 : i32
    %c0_i32_1 = arith.constant 0 : i32
    %c0_i32_2 = arith.constant 0 : i32
    return %c0_i32, %c0_i32_0, %c0_i32_1 : i32, i32, i32
  }
  func.func @transform_6(%arg0: i32) -> (i32, i32, i32) {
    %c0_i32 = arith.constant 0 : i32
    %c0_i32_0 = arith.constant 0 : i32
    %c0_i32_1 = arith.constant 0 : i32
    %c0_i32_2 = arith.constant 0 : i32
    return %c0_i32, %c0_i32_0, %c0_i32_1 : i32, i32, i32
  }
  func.func @transform_7(%arg0: i32) -> (i32, i32) {
    %c0_i32 = arith.constant 0 : i32
    %c0_i32_0 = arith.constant 0 : i32
    return %arg0, %c0_i32 : i32, i32
  }
}

</mosaic_0001>

<bundles_post_ra>
// kernel: tpu_custom_call.1
= control target key start
LH: loop header
LB: loop body
LE: loop exit
PB: predicated region body
PF: predicated region fallthrough
CT: control target
= control target key end

     0   :  { %s2596_s24 = smov 0   ;;  %s3019_s0 = inlined_call_operand.vmem [shape: bf16[128,32], index: 0, kind: input, shape index: {}]   ;;  %s3020_s1 = inlined_call_operand.vmem [shape: bf16[128,32], index: 1, kind: input, shape index: {}]   ;;  %s3021_s2 = inlined_call_operand.vmem [shape: bf16[128,32], index: 2, kind: input, shape index: {}]   ;;  %s3022_s3 = inlined_call_operand.vmem [shape: bf16[128,16], index: 3, kind: input, shape index: {}]   ;;  %s3023_s4 = inlined_call_operand.vmem [shape: f32[6,32,32], index: 4, kind: input, shape index: {}]   ;;  %s3024_s5 = inlined_call_operand.vmem [shape: f32[2,16,32], index: 5, kind: input, shape index: {}]   ;;  %s3025_s6 = inlined_call_operand.vmem [shape: f32[5,1,32], index: 6, kind: input, shape index: {}]   ;;  %s3026_s7 = inlined_call_operand.vmem [shape: bf16[128,32], index: 7, kind: output, shape index: {}]  }
   0x1 LB: > { %s1908_s25 = sadd.s32 4294967295, %s2554_s24   ;;  %p1912_p0 = scmp.ge.s32.totalorder %s2554_s24, 1  ;;  %s2554_s24 = sphi %s2596_s24, %s17_s24  }
   0x2   : > { %p271_p1 = scmp.lt.s32.totalorder %s2554_s24, 3 }
   0x4   : > { %p272_p2 = pnand %p1912_p0, %p271_p1 }
   0x5   : > { %s1913_s26 = sshll.u32 (!%p272_p2), %s1908_s25, 3 }
   0x6   : > { %275 = sbr.rel (%p272_p2) target bundleno = 837 (0x345), region = 48  ;;  %p319_p3 = scmp.lt.s32.totalorder (!%p272_p2), %s1913_s26, 15 }
   0xb   : > { %s3028_s26 = smov (!%p319_p3, %s1913_s26), 15  ;;  %vm412_vm0 = vcmask 130048   ;;  %v504_v60 = vld [vmem:[%s3023_s4 + $0x18] sm:$0xff]  ;;  %v503_v61 = vld [vmem:[%s3023_s4 + $0x10] sm:$0xff]  ;;  %v502_v62 = vld [vmem:[%s3023_s4 + $0x8] sm:$0xff]  ;;  %vm673_vm1 = vcmask 261120  }
   0xc   : > { %s2604_s27 = sshll.u32 %s3028_s26, 2  ;;  %2244 = vmatprep.subr.mxu1 %v504_v60  ;;  %v531_v63 = vld [vmem:[%s3024_s5 + $0x8] sm:$0xff]  ;;  %vm1807_vm2 = vcmask 257024  }
   0xd   : > { %s340_s30 = scalar_lea.vmem %s3022_s3, %s2604_s27  ;;  %2245 = vmatpush3.msra.mxu1 %v504_v60  ;;  %2228 = vmatprep.subr.mxu0 %v531_v63  ;;  %s2666_s18 = scalar_lea.vmem %s3020_s1, %s2604_s27 }
   0xe   : > { %v2109_v0 = vld [vmem:[%s340_s30] sm:$0xff]   ;;  %v2133_v1 = vld [vmem:[%s340_s30 + $0x8] sm:$0xff]   ;;  %v2134_v6 = vld [vmem:[%s340_s30 + $0x10] sm:$0xff]   ;;  %2246 = vmatprep.subr.mxu1 %v503_v61  ;;  %2229 = vmatpush3.msra.mxu0 %v531_v63  ;;  %s334_s14 = scalar_lea.vmem %s3021_s2, %s2604_s27  ;;  %s322_s25 = scalar_lea.vmem %s3019_s0, %s2604_s27 }
   0xf   : > { %v2110_v2 = vunpack.c.l.bf16 %v2109_v0  ;;  %v2114_v3 = vunpack.c.l.bf16 %v2133_v1  ;;  %v2111_v4 = vunpack.c.h.bf16 %v2109_v0  ;;  %v2115_v5 = vunpack.c.h.bf16 %v2133_v1  ;;  %v2135_v13 = vld [vmem:[%s340_s30 + $0x18] sm:$0xff]   ;;  %2247 = vmatpush3.msra.mxu1 %v503_v61  ;;  %v2669_v0 = vld [vmem:[%s2666_s18] sm:$0xff]   ;;  %s2998_s22 = scalar_lea.vmem %s3026_s7, %s2604_s27 }
  0x10   : > { %v2118_v11 = vunpack.c.l.bf16 %v2134_v6  ;;  %v2119_v12 = vunpack.c.h.bf16 %v2134_v6  ;;  %v2122_v16 = vunpack.c.l.bf16 %v2135_v13  ;;  %v2123_v17 = vunpack.c.h.bf16 %v2135_v13  ;;  %2248 = vmatprep.subr.mxu1 %v502_v62  ;;  %v501_v1 = vld [vmem:[%s3023_s4] sm:$0xff]  ;;  %v1926_v6 = vld [vmem:[%s3023_s4 + $0x38] sm:$0xff] }
  0x11   : > { %v413_v7 = vsel %vm412_vm0, %v2110_v2, -inf  ;;  %v419_v8 = vsel %vm412_vm0, %v2114_v3, -inf  ;;  %v416_v9 = vsel %vm412_vm0, %v2111_v4, -inf  ;;  %v422_v10 = vsel %vm412_vm0, %v2115_v5, -inf  ;;  %2249 = vmatpush3.msra.mxu1 %v502_v62 }
  0x12   : > { %414 = vmax.xlane.f32.xlu0 %v413_v7  ;;  %420 = vmax.xlane.f32.xlu1 %v419_v8  ;;  %v425_v14 = vsel %vm412_vm0, %v2118_v11, -inf  ;;  %v428_v15 = vsel %vm412_vm0, %v2119_v12, -inf  ;;  %v431_v18 = vsel %vm412_vm0, %v2122_v16, -inf  ;;  %v434_v19 = vsel %vm412_vm0, %v2123_v17, -inf  ;;  %v2694_v7 = vld [vmem:[%s2666_s18 + $0x8] sm:$0xff]  }
  0x13   : > { %2250 = vmatprep.subr.mxu1 %v501_v1  ;;  %v2082_v8 = vunpack.c.l.bf16 %v2694_v7 }
  0x14   : > { %2251 = vmatpush3.msra.mxu1 %v501_v1 }
  0x15   : > { %2280 = vmatprep.subr.mxu1 %v1926_v6 }
  0x16   : > { %417 = vmax.xlane.f32.xlu0 %v416_v9  ;;  %423 = vmax.xlane.f32.xlu1 %v422_v10  ;;  %v2083_v9 = vunpack.c.h.bf16 %v2694_v7  ;;  %v1925_v10 = vld [vmem:[%s3023_s4 + $0x30] sm:$0xff]  ;;  %v1935_v7 = vld [vmem:[%s3023_s4 + $0x80] sm:$0xff] }
  0x1a   : > { %426 = vmax.xlane.f32.xlu0 %v425_v14  ;;  %429 = vmax.xlane.f32.xlu1 %v428_v15  ;;  %v1924_v14 = vld [vmem:[%s3023_s4 + $0x28] sm:$0xff]  ;;  %v2723_v15 = vld [vmem:[%s2666_s18 + $0x18] sm:$0xff]  }
  0x1e   : > { %432 = vmax.xlane.f32.xlu0 %v431_v18  ;;  %435 = vmax.xlane.f32.xlu1 %v434_v19  ;;  %v1923_v18 = vld [vmem:[%s3023_s4 + $0x20] sm:$0xff] }
  0x1f   : > { %v2093_v19 = vld [vmem:[%s334_s14] sm:$0xff]  }
  0x9b   : > { %v415_v20 = vpop.xlane.xlu0 %414  ;;  %v421_v21 = vpop.xlane.xlu1 %420 }
  0x9c   : > { %v437_v22 = vsub.f32 %v2110_v2, %v415_v20  ;;  %v439_v23 = vsub.f32 %v2114_v3, %v421_v21  ;;  %v530_v2 = vld [vmem:[%s3024_s5] sm:$0xff]  ;;  %v2078_v3 = vunpack.c.l.bf16 %v2669_v0  ;;  %v2094_v20 = vunpack.c.l.bf16 %v2093_v19 }
  0x9d   : > { %2230 = vmatprep.subr.mxu0 %v530_v2  ;;  %v2095_v21 = vunpack.c.h.bf16 %v2093_v19 }
  0x9e   : > { %v445_v24 = vmul.f32 1.442695, %v437_v22  ;;  %v449_v25 = vmul.f32 1.442695, %v439_v23  ;;  %2252 = vmatprep.mubr.msk.f32.mxu1 %vm673_vm1, %v2078_v3  ;;  %2231 = vmatpush3.msra.mxu0 %v530_v2  ;;  %v2130_v22 = vld [vmem:[%s334_s14 + $0x8] sm:$0xff]   ;;  %v1937_v2 = vld [vmem:[%s3023_s4 + $0x90] sm:$0xff] }
  0x9f   : > { %v418_v26 = vpop.xlane.xlu0 %417  ;;  %v424_v27 = vpop.xlane.xlu1 %423  ;;  %v2098_v23 = vunpack.c.l.bf16 %v2130_v22 }
  0xa0   : > { %2388 = vpow2.f32 %v445_v24  ;;  %v438_v28 = vsub.f32 %v2111_v4, %v418_v26  ;;  %v440_v29 = vsub.f32 %v2115_v5, %v424_v27  ;;  %v2079_v4 = vunpack.c.h.bf16 %v2669_v0  ;;  %v2682_v5 = vld [vmem:[%s3024_s5 + $0x18] sm:$0xff] }
  0xa1   : > { %2390 = vpow2.f32 %v449_v25  ;;  %2264 = vmatprep.subr.mxu0 %v2682_v5  ;;  %v2099_v24 = vunpack.c.h.bf16 %v2130_v22  ;;  %v2131_v25 = vld [vmem:[%s334_s14 + $0x10] sm:$0xff]   ;;  %v1942_v0 = vld [vmem:[%s3023_s4 + $0xb8] sm:$0xff] }
  0xa2   : > { %v447_v30 = vmul.f32 1.442695, %v438_v28  ;;  %v451_v31 = vmul.f32 1.442695, %v440_v29  ;;  %2253 = vmatmul.mubr.msk.f32.vlgmr.msra.gmra.mxu1 %vm673_vm1, %v2079_v4  ;;  %v2102_v26 = vunpack.c.l.bf16 %v2131_v25  ;;  %v2103_v27 = vunpack.c.h.bf16 %v2131_v25  ;;  %v2132_v28 = vld [vmem:[%s334_s14 + $0x18] sm:$0xff]  }
  0xa3   : > { %v427_v32 = vpop.xlane.xlu0 %426  ;;  %v430_v33 = vpop.xlane.xlu1 %429  ;;  %2281 = vmatpush3.msra.mxu1 %v1926_v6  ;;  %2255 = vmatprep.mubr.msk.f32.mxu1 %vm673_vm1, %v2082_v8  ;;  %v2106_v29 = vunpack.c.l.bf16 %v2132_v28  ;;  %v1940_v6 = vld [vmem:[%s3023_s4 + $0xa8] sm:$0xff] }
  0xa4   : > { %2392 = vpow2.f32 %v447_v30  ;;  %v441_v34 = vsub.f32 %v2118_v11, %v427_v32  ;;  %v442_v35 = vsub.f32 %v2119_v12, %v430_v33  ;;  %2282 = vmatprep.subr.mxu1 %v1925_v10  ;;  %v2709_v11 = vld [vmem:[%s2666_s18 + $0x10] sm:$0xff]   ;;  %v2107_v30 = vunpack.c.h.bf16 %v2132_v28  ;;  %v1932_v33 = vld [vmem:[%s3023_s4 + $0x68] sm:$0xff] }
  0xa5   : > { %2394 = vpow2.f32 %v451_v31  ;;  %2283 = vmatpush3.msra.mxu1 %v1925_v10  ;;  %v2086_v12 = vunpack.c.l.bf16 %v2709_v11  ;;  %v2087_v13 = vunpack.c.h.bf16 %v2709_v11  ;;  %v1934_v31 = vld [vmem:[%s3023_s4 + $0x78] sm:$0xff]  ;;  %v1933_v32 = vld [vmem:[%s3023_s4 + $0x70] sm:$0xff]  ;;  %v1939_v10 = vld [vmem:[%s3023_s4 + $0xa0] sm:$0xff] }
  0xa6   : > { %v453_v36 = vmul.f32 1.442695, %v441_v34  ;;  %v455_v37 = vmul.f32 1.442695, %v442_v35  ;;  %2256 = vmatmul.mubr.msk.f32.gmra.mxu1 %vm673_vm1, %v2083_v9  ;;  %2284 = vmatprep.subr.mxu1 %v1924_v14  ;;  %v1931_v34 = vld [vmem:[%s3023_s4 + $0x60] sm:$0xff]  ;;  %v2867_v11 = vld [vmem:[%s322_s25 + $0x8] sm:$0xff]  }
  0xa7   : > { %v433_v38 = vpop.xlane.xlu0 %432  ;;  %v436_v39 = vpop.xlane.xlu1 %435  ;;  %2258 = vmatprep.mubr.msk.f32.mxu1 %vm673_vm1, %v2086_v12  ;;  %2285 = vmatpush3.msra.mxu1 %v1924_v14  ;;  %v2877_v14 = vld [vmem:[%s322_s25 + $0x10] sm:$0xff]  }
  0xa8   : > { %2396 = vpow2.f32 %v453_v36  ;;  %v443_v40 = vsub.f32 %v2122_v16, %v433_v38  ;;  %v444_v41 = vsub.f32 %v2123_v17, %v436_v39  ;;  %v2090_v16 = vunpack.c.l.bf16 %v2723_v15  ;;  %2286 = vmatprep.subr.mxu1 %v1923_v18 }
  0xa9   : > { %2398 = vpow2.f32 %v455_v37  ;;  %v2091_v17 = vunpack.c.h.bf16 %v2723_v15  ;;  %2287 = vmatpush3.msra.mxu1 %v1923_v18  ;;  %v2070_v15 = vunpack.c.l.bf16 %v2877_v14 }
  0xaa   : > { %v457_v42 = vmul.f32 1.442695, %v443_v40  ;;  %v459_v43 = vmul.f32 1.442695, %v444_v41  ;;  %2259 = vmatmul.mubr.msk.f32.gmra.mxu1 %vm673_vm1, %v2087_v13  ;;  %2320 = vmatprep.subr.mxu1 %v1934_v31 }
  0xab   : > { %2261 = vmatprep.mubr.msk.f32.mxu1 %vm673_vm1, %v2090_v16 }
  0xac   : > { %2400 = vpow2.f32 %v457_v42 }
  0xad   : > { %v2618_v44 = vpop.eup %2388  ;;  %2402 = vpow2.f32 %v459_v43 }
  0xae   : > { %v2620_v45 = vpop.eup %2390  ;;  %v461_v46 = vsel %vm412_vm0, %v2618_v44, 0.0  ;;  %2262 = vmatmul.mubr.msk.f32.gmra.mxu1 %vm673_vm1, %v2091_v17 }
  0xaf   : > { %462 = vadd.xlane.f32.xlu0 %v461_v46  ;;  %v467_v47 = vsel %vm412_vm0, %v2620_v45, 0.0  ;;  %2288 = vmatprep.mubr.msk.f32.mxu1 %vm673_vm1, %v2094_v20 }
  0xb1   : > { %v2626_v48 = vpop.eup %2392 }
  0xb2   : > { %v2628_v49 = vpop.eup %2394  ;;  %v464_v50 = vsel %vm412_vm0, %v2626_v48, 0.0  ;;  %2289 = vmatmul.mubr.msk.f32.vlgmr.msra.gmra.mxu1 %vm673_vm1, %v2095_v21 }
  0xb3   : > { %468 = vadd.xlane.f32.xlu0 %v467_v47  ;;  %465 = vadd.xlane.f32.xlu1 %v464_v50  ;;  %v470_v51 = vsel %vm412_vm0, %v2628_v49, 0.0 }
  0xb4   : > { %2291 = vmatprep.mubr.msk.f32.mxu1 %vm673_vm1, %v2098_v23  ;;  %2321 = vmatpush3.msra.mxu1 %v1934_v31 }
  0xb5   : > { %v2634_v52 = vpop.eup %2396  ;;  %2322 = vmatprep.subr.mxu1 %v1933_v32 }
  0xb6   : > { %v2636_v53 = vpop.eup %2398  ;;  %v473_v54 = vsel %vm412_vm0, %v2634_v52, 0.0  ;;  %2292 = vmatmul.mubr.msk.f32.gmra.mxu1 %vm673_vm1, %v2099_v24 }
  0xb7   : > { %471 = vadd.xlane.f32.xlu1 %v470_v51  ;;  %474 = vadd.xlane.f32.xlu0 %v473_v54  ;;  %v476_v55 = vsel %vm412_vm0, %v2636_v53, 0.0 }
  0xb8   : > { %2294 = vmatprep.mubr.msk.f32.mxu1 %vm673_vm1, %v2102_v26  ;;  %2323 = vmatpush3.msra.mxu1 %v1933_v32 }
  0xb9   : > { %v2642_v56 = vpop.eup %2400  ;;  %2324 = vmatprep.subr.mxu1 %v1932_v33 }
  0xba   : > { %v2644_v57 = vpop.eup %2402  ;;  %v479_v58 = vsel %vm412_vm0, %v2642_v56, 0.0  ;;  %2295 = vmatmul.mubr.msk.f32.gmra.mxu1 %vm673_vm1, %v2103_v27 }
  0xbb   : > { %477 = vadd.xlane.f32.xlu1 %v476_v55  ;;  %480 = vadd.xlane.f32.xlu0 %v479_v58  ;;  %v482_v59 = vsel %vm412_vm0, %v2644_v57, 0.0  ;;  %v1943_v55 = vld [vmem:[%s3024_s5 + $0x10] sm:$0xff] }
  0xbc   : > { %2297 = vmatprep.mubr.msk.f32.mxu1 %vm673_vm1, %v2106_v29  ;;  %2325 = vmatpush3.msra.mxu1 %v1932_v33  ;;  %v1965_v33 = vld [vmem:[%s3025_s6] ss:$0 sm:$0xff] }
  0xbd   : > { %2326 = vmatprep.subr.mxu1 %v1931_v34 }
  0xbe   : > { %2298 = vmatmul.mubr.msk.f32.gmra.mxu1 %vm673_vm1, %v2107_v30 }
  0xbf   : > { %483 = vadd.xlane.f32.xlu1 %v482_v59  ;;  %2328 = vmatprep.mubr.msk.f32.mxu1 %vm673_vm1, %v2094_v20 }
  0xc0   : > { %2327 = vmatpush3.msra.mxu1 %v1931_v34 }
  0xc2   : > { %2329 = vmatmul.mubr.msk.f32.vlgmr.msra.gmra.mxu1 %vm673_vm1, %v2095_v21 }
  0xc3   : > { %2331 = vmatprep.mubr.msk.f32.mxu1 %vm673_vm1, %v2098_v23 }
  0xc6   : > { %2332 = vmatmul.mubr.msk.f32.gmra.mxu1 %vm673_vm1, %v2099_v24 }
  0xc7   : > { %2334 = vmatprep.mubr.msk.f32.mxu1 %vm673_vm1, %v2102_v26 }
  0xca   : > { %2335 = vmatmul.mubr.msk.f32.gmra.mxu1 %vm673_vm1, %v2103_v27 }
  0xcb   : > { %2337 = vmatprep.mubr.msk.f32.mxu1 %vm673_vm1, %v2106_v29 }
  0xce   : > { %2338 = vmatmul.mubr.msk.f32.gmra.mxu1 %vm673_vm1, %v2107_v30 }
 0x138   : > { %v463_v35 = vpop.xlane.xlu0 %462 }
 0x139   : > { %2404 = vrcp.f32 %v463_v35 }
 0x13c   : > { %v466_v36 = vpop.xlane.xlu1 %465  ;;  %v469_v37 = vpop.xlane.xlu0 %468 }
 0x13d   : > { %2406 = vrcp.f32 %v466_v36 }
 0x13e   : > { %2408 = vrcp.f32 %v469_v37 }
 0x140   : > { %v472_v38 = vpop.xlane.xlu1 %471  ;;  %v475_v39 = vpop.xlane.xlu0 %474 }
 0x141   : > { %2410 = vrcp.f32 %v472_v38 }
 0x142   : > { %2412 = vrcp.f32 %v475_v39 }
 0x144   : > { %v478_v40 = vpop.xlane.xlu1 %477  ;;  %v481_v41 = vpop.xlane.xlu0 %480 }
 0x145   : > { %2414 = vrcp.f32 %v478_v40 }
 0x146   : > { %v2405_v42 = vpop.eup %2404  ;;  %2416 = vrcp.f32 %v481_v41 }
 0x147   : > { %v493_v43 = vmul.f32 %v2405_v42, %v2618_v44  ;;  %v1930_v44 = vld [vmem:[%s3023_s4 + $0x58] sm:$0xff] }
 0x148   : > { %v484_v46 = vpop.xlane.xlu1 %483 }
 0x149   : > { %2418 = vrcp.f32 %v484_v46  ;;  %2232 = vmatprep.mubr.msk.f32.mxu0 %vm412_vm0, %v493_v43 }
 0x14a   : > { %v2407_v47 = vpop.eup %2406 }
 0x14b   : > { %v2409_v50 = vpop.eup %2408  ;;  %v494_v51 = vmul.f32 %v2407_v47, %v2626_v48 }
 0x14c   : > { %v495_v54 = vmul.f32 %v2409_v50, %v2620_v45 }
 0x14d   : > { %2233 = vmatmul.mubr.msk.f32.vlgmr.msra.gmra.mxu0 %vm412_vm0, %v494_v51 }
 0x14e   : > { %v2411_v58 = vpop.eup %2410  ;;  %2265 = vmatpush3.msra.mxu0 %v2682_v5  ;;  %2235 = vmatprep.mubr.msk.f32.mxu0 %vm412_vm0, %v495_v54  ;;  %v2851_v5 = vld [vmem:[%s322_s25] sm:$0xff]  }
 0x14f   : > { %v2413_v59 = vpop.eup %2412  ;;  %v496_v48 = vmul.f32 %v2411_v58, %v2628_v49  ;;  %2266 = vmatprep.subr.mxu0 %v1943_v55 }
 0x150   : > { %v497_v45 = vmul.f32 %v2413_v59, %v2634_v52  ;;  %2267 = vmatpush3.msra.mxu0 %v1943_v55  ;;  %v1929_v52 = vld [vmem:[%s3023_s4 + $0x50] sm:$0xff] }
 0x151   : > { %2236 = vmatmul.mubr.msk.f32.gmra.mxu0 %vm412_vm0, %v496_v48  ;;  %2300 = vmatprep.subr.mxu0 %v1930_v44 }
 0x152   : > { %v2415_v60 = vpop.eup %2414  ;;  %2238 = vmatprep.mubr.msk.f32.mxu0 %vm412_vm0, %v497_v45 }
 0x153   : > { %v2417_v61 = vpop.eup %2416  ;;  %v498_v62 = vmul.f32 %v2415_v60, %v2636_v53  ;;  %v1928_v53 = vld [vmem:[%s3023_s4 + $0x48] sm:$0xff] }
 0x154   : > { %v499_v63 = vmul.f32 %v2417_v61, %v2642_v56  ;;  %v1927_v56 = vld [vmem:[%s3023_s4 + $0x40] sm:$0xff] }
 0x155   : > { %2239 = vmatmul.mubr.msk.f32.gmra.mxu0 %vm412_vm0, %v498_v62 }
 0x156   : > { %v2419_v1 = vpop.eup %2418  ;;  %2241 = vmatprep.mubr.msk.f32.mxu0 %vm412_vm0, %v499_v63 }
 0x157   : > { %v500_v49 = vmul.f32 %v2419_v1, %v2644_v57  ;;  %v1938_v57 = vld [vmem:[%s3023_s4 + $0x98] sm:$0xff] }
 0x158   : > { %2360 = vmatprep.subr.mxu1 %v1938_v57 }
 0x159   : > { %2242 = vmatmul.mubr.msk.f32.gmra.mxu0 %vm412_vm0, %v500_v49  ;;  %2361 = vmatpush3.msra.mxu1 %v1938_v57 }
 0x15a   : > { %2268 = vmatprep.mubr.msk.f32.mxu0 %vm412_vm0, %v493_v43  ;;  %2362 = vmatprep.subr.mxu1 %v1937_v2 }
 0x15b   : > { %2363 = vmatpush3.msra.mxu1 %v1937_v2 }
 0x15d   : > { %2269 = vmatmul.mubr.msk.f32.vlgmr.msra.gmra.mxu0 %vm412_vm0, %v494_v51 }
 0x15e   : > { %2271 = vmatprep.mubr.msk.f32.mxu0 %vm412_vm0, %v495_v54  ;;  %2301 = vmatpush3.msra.mxu0 %v1930_v44 }
 0x15f   : > { %2302 = vmatprep.subr.mxu0 %v1929_v52 }
 0x160   : > { %2303 = vmatpush3.msra.mxu0 %v1929_v52 }
 0x161   : > { %2272 = vmatmul.mubr.msk.f32.gmra.mxu0 %vm412_vm0, %v496_v48  ;;  %2304 = vmatprep.subr.mxu0 %v1928_v53  ;;  %v2906_v48 = vld [vmem:[%s3025_s6 + $0x1] ss:$0 sm:$0xff] }
 0x162   : > { %2274 = vmatprep.mubr.msk.f32.mxu0 %vm412_vm0, %v497_v45  ;;  %2305 = vmatpush3.msra.mxu0 %v1928_v53  ;;  %v2254_v20 = vpop.f32.mrf.mxu1 }
 0x163   : > { %2306 = vmatprep.subr.mxu0 %v1927_v56 }
 0x164   : > { %2307 = vmatpush3.msra.mxu0 %v1927_v56  ;;  %v764_v21 = vpop.f32.mrf.mxu1 }
 0x165   : > { %2275 = vmatmul.mubr.msk.f32.gmra.mxu0 %vm412_vm0, %v498_v62  ;;  %2340 = vmatprep.subr.mxu0 %v1942_v0 }
 0x166   : > { %2277 = vmatprep.mubr.msk.f32.mxu0 %vm412_vm0, %v499_v63  ;;  %v2257_v22 = vpop.f32.mrf.mxu1 }
 0x168   : > { %v774_v23 = vpop.f32.mrf.mxu1 }
 0x169   : > { %2278 = vmatmul.mubr.msk.f32.gmra.mxu0 %vm412_vm0, %v500_v49 }
 0x16a   : > { %2308 = vmatprep.mubr.msk.f32.mxu0 %vm673_vm1, %v2078_v3  ;;  %v1941_v3 = vld [vmem:[%s3023_s4 + $0xb0] sm:$0xff]  ;;  %v2260_v24 = vpop.f32.mrf.mxu1 }
 0x16c   : > { %v784_v25 = vpop.f32.mrf.mxu1 }
 0x16d   : > { %2309 = vmatmul.mubr.msk.f32.vlgmr.msra.gmra.mxu0 %vm673_vm1, %v2079_v4  ;;  %v1936_v4 = vld [vmem:[%s3023_s4 + $0x88] sm:$0xff] }
 0x16e   : > { %2311 = vmatprep.mubr.msk.f32.mxu0 %vm673_vm1, %v2082_v8  ;;  %2341 = vmatpush3.msra.mxu0 %v1942_v0  ;;  %v2062_v8 = vunpack.c.l.bf16 %v2851_v5  ;;  %v2263_v26 = vpop.f32.mrf.mxu1 }
 0x16f   : > { %2342 = vmatprep.subr.mxu0 %v1941_v3  ;;  %2364 = vmatprep.subr.mxu1 %v1936_v4 }
 0x170   : > { %2343 = vmatpush3.msra.mxu0 %v1941_v3  ;;  %2365 = vmatpush3.msra.mxu1 %v1936_v4  ;;  %v794_v27 = vpop.f32.mrf.mxu1 }
 0x171   : > { %2312 = vmatmul.mubr.msk.f32.gmra.mxu0 %vm673_vm1, %v2083_v9  ;;  %2344 = vmatprep.subr.mxu0 %v1940_v6  ;;  %v2063_v9 = vunpack.c.h.bf16 %v2851_v5 }
 0x172   : > { %2314 = vmatprep.mubr.msk.f32.mxu0 %vm673_vm1, %v2086_v12  ;;  %2366 = vmatprep.subr.mxu1 %v1935_v7  ;;  %v2066_v12 = vunpack.c.l.bf16 %v2867_v11  ;;  %v2290_v30 = vpop.f32.mrf.mxu1 }
 0x173   : > { %2345 = vmatpush3.msra.mxu0 %v1940_v6  ;;  %2367 = vmatpush3.msra.mxu1 %v1935_v7 }
 0x174   : > { %2346 = vmatprep.subr.mxu0 %v1939_v10  ;;  %2368 = vmatprep.mubr.msk.f32.mxu1 %vm673_vm1, %v2062_v8  ;;  %v1060_v36 = vpop.f32.mrf.mxu1 }
 0x175   : > { %2315 = vmatmul.mubr.msk.f32.gmra.mxu0 %vm673_vm1, %v2087_v13  ;;  %2369 = vmatmul.mubr.msk.f32.vlgmr.msra.gmra.mxu1 %vm673_vm1, %v2063_v9  ;;  %v2067_v13 = vunpack.c.h.bf16 %v2867_v11 }
 0x176   : > { %2317 = vmatprep.mubr.msk.f32.mxu0 %vm673_vm1, %v2090_v16  ;;  %2347 = vmatpush3.msra.mxu0 %v1939_v10  ;;  %v2071_v16 = vunpack.c.h.bf16 %v2877_v14  ;;  %v2293_v43 = vpop.f32.mrf.mxu1 }
 0x177   : > { %2371 = vmatprep.mubr.msk.f32.mxu1 %vm673_vm1, %v2066_v12 }
 0x178   : > { %v1070_v58 = vpop.f32.mrf.mxu1 }
 0x179   : > { %2318 = vmatmul.mubr.msk.f32.gmra.mxu0 %vm673_vm1, %v2091_v17  ;;  %2372 = vmatmul.mubr.msk.f32.gmra.mxu1 %vm673_vm1, %v2067_v13  ;;  %v2887_v17 = vld [vmem:[%s322_s25 + $0x18] sm:$0xff]  }
 0x17a   : > { %2374 = vmatprep.mubr.msk.f32.mxu1 %vm673_vm1, %v2070_v15  ;;  %v2074_v18 = vunpack.c.l.bf16 %v2887_v17  ;;  %v2075_v19 = vunpack.c.h.bf16 %v2887_v17  ;;  %v2296_v1 = vpop.f32.mrf.mxu1 }
 0x17c   : > { %v1080_v10 = vpop.f32.mrf.mxu1 }
 0x17d   : > { %2375 = vmatmul.mubr.msk.f32.gmra.mxu1 %vm673_vm1, %v2071_v16 }
 0x17e   : > { %2377 = vmatprep.mubr.msk.f32.mxu1 %vm673_vm1, %v2074_v18 }
 0x181   : > { %2378 = vmatmul.mubr.msk.f32.gmra.mxu1 %vm673_vm1, %v2075_v19 }
 0x20d   : > { %v2234_v28 = vpop.f32.mrf.mxu0 }
 0x20e   : > { %v770_v32 = vadd.f32 %v2254_v20, %v2234_v28 }
 0x20f   : > { %v634_v29 = vpop.f32.mrf.mxu0 }
 0x210   : > { %v765_v34 = vadd.f32 %v764_v21, %v634_v29  ;;  %v810_v39 = vadd.f32 %v1965_v33, %v770_v32  ;;  %v2299_v32 = vpop.f32.mrf.mxu1 }
 0x211   : > { %v2237_v31 = vpop.f32.mrf.mxu0 }
 0x212   : > { %v780_v37 = vadd.f32 %v2257_v22, %v2237_v31  ;;  %v809_v40 = vadd.f32 %v1965_v33, %v765_v34  ;;  %v1967_v50 = vmul.f32 -1.442695, %v810_v39 }
 0x213   : > { %v644_v35 = vpop.f32.mrf.mxu0 }
 0x214   : > { %v775_v41 = vadd.f32 %v774_v23, %v644_v35  ;;  %v812_v46 = vadd.f32 %v1965_v33, %v780_v37  ;;  %v1966_v51 = vmul.f32 -1.442695, %v809_v40  ;;  %2420 = vpow2.f32 %v1967_v50 }
 0x215   : > { %v2240_v38 = vpop.f32.mrf.mxu0 }
 0x216   : > { %v811_v54 = vadd.f32 %v1965_v33, %v775_v41  ;;  %v1969_v59 = vmul.f32 -1.442695, %v812_v46  ;;  %v790_v60 = vadd.f32 %v2260_v24, %v2240_v38  ;;  %2422 = vpow2.f32 %v1966_v51 }
 0x217   : > { %v654_v42 = vpop.f32.mrf.mxu0 }
 0x218   : > { %v785_v44 = vadd.f32 %v784_v25, %v654_v42  ;;  %v1968_v62 = vmul.f32 -1.442695, %v811_v54  ;;  %2424 = vpow2.f32 %v1969_v59  ;;  %v814_v0 = vadd.f32 %v1965_v33, %v790_v60 }
 0x219   : > { %v2243_v47 = vpop.f32.mrf.mxu0 }
 0x21a   : > { %v813_v49 = vadd.f32 %v1965_v33, %v785_v44  ;;  %v800_v2 = vadd.f32 %v2263_v26, %v2243_v47  ;;  %2426 = vpow2.f32 %v1968_v62 }
 0x21b   : > { %v664_v55 = vpop.f32.mrf.mxu0 }
 0x21c   : > { %v795_v52 = vadd.f32 %v794_v27, %v664_v55  ;;  %v1970_v20 = vmul.f32 -1.442695, %v813_v49  ;;  %v1971_v27 = vmul.f32 -1.442695, %v814_v0  ;;  %v816_v28 = vadd.f32 %v1965_v33, %v800_v2 }
 0x21d   : > { %v2270_v45 = vpop.f32.mrf.mxu0 }
 0x21e   : > { %v1066_v61 = vadd.f32 %v2290_v30, %v2270_v45  ;;  %v815_v21 = vadd.f32 %v1965_v33, %v795_v52  ;;  %v1973_v39 = vmul.f32 -1.442695, %v816_v28 }
 0x21f   : > { %v931_v63 = vpop.f32.mrf.mxu0 }
 0x220   : > { %v1106_v53 = vadd.f32 %v2906_v48, %v1066_v61  ;;  %v1061_v56 = vadd.f32 %v1060_v36, %v931_v63  ;;  %v1972_v34 = vmul.f32 -1.442695, %v815_v21 }
 0x221   : > { %v2273_v57 = vpop.f32.mrf.mxu0  ;;  %v2421_v33 = vpop.eup %2420 }
 0x222   : > { %v1992_v3 = vmul.f32 -1.442695, %v1106_v53  ;;  %v1105_v4 = vadd.f32 %v2906_v48, %v1061_v56  ;;  %v1076_v6 = vadd.f32 %v2293_v43, %v2273_v57  ;;  %v1090_v43 = vpop.f32.mrf.mxu1 }
 0x223   : > { %v941_v7 = vpop.f32.mrf.mxu0  ;;  %v2423_v47 = vpop.eup %2422 }
 0x224   : > { %v1991_v22 = vmul.f32 -1.442695, %v1105_v4  ;;  %v1071_v23 = vadd.f32 %v1070_v58, %v941_v7  ;;  %2428 = vpow2.f32 %v1992_v3  ;;  %v1108_v24 = vadd.f32 %v2906_v48, %v1076_v6  ;;  %v2330_v62 = vpop.f32.mrf.mxu1 }
 0x225   : > { %v2276_v25 = vpop.f32.mrf.mxu0  ;;  %v2425_v55 = vpop.eup %2424  ;;  %v841_v60 = vadd.f32 1.0, %v2423_v47 }
 0x226   : > { %v1107_v29 = vadd.f32 %v2906_v48, %v1071_v23  ;;  %v1086_v26 = vadd.f32 %v2296_v1, %v2276_v25  ;;  %2430 = vpow2.f32 %v1991_v22  ;;  %v1994_v30 = vmul.f32 -1.442695, %v1108_v24  ;;  %v1344_v57 = vpop.f32.mrf.mxu1 }
 0x227   : > { %v951_v31 = vpop.f32.mrf.mxu0  ;;  %2432 = vpow2.f32 %v1970_v20  ;;  %v2427_v45 = vpop.eup %2426  ;;  %v842_v1 = vadd.f32 1.0, %v2421_v33  ;;  %v844_v3 = vadd.f32 1.0, %v2425_v55 }
 0x228   : > { %v1993_v35 = vmul.f32 -1.442695, %v1107_v29  ;;  %v1110_v36 = vadd.f32 %v2906_v48, %v1086_v26  ;;  %2434 = vpow2.f32 %v1994_v30  ;;  %v1081_v37 = vadd.f32 %v1080_v10, %v951_v31  ;;  %v2333_v21 = vpop.f32.mrf.mxu1 }
 0x229   : > { %v2279_v38 = vpop.f32.mrf.mxu0  ;;  %2436 = vpow2.f32 %v1971_v27  ;;  %v843_v56 = vadd.f32 1.0, %v2427_v45 }
 0x22a   : > { %v1996_v40 = vmul.f32 -1.442695, %v1110_v36  ;;  %v1096_v41 = vadd.f32 %v2299_v32, %v2279_v38  ;;  %2438 = vpow2.f32 %v1993_v35  ;;  %v1109_v42 = vadd.f32 %v2906_v48, %v1081_v37  ;;  %v1354_v31 = vpop.f32.mrf.mxu1 }
 0x22b   : > { %v961_v46 = vpop.f32.mrf.mxu0  ;;  %2440 = vpow2.f32 %v1972_v34  ;;  %v2921_v34 = vld [vmem:[%s3025_s6 + $0x3] ss:$0 sm:$0xff] }
 0x22c   : > { %v1112_v50 = vadd.f32 %v2906_v48, %v1096_v41  ;;  %v1091_v51 = vadd.f32 %v1090_v43, %v961_v46  ;;  %2442 = vpow2.f32 %v1996_v40  ;;  %v1995_v54 = vmul.f32 -1.442695, %v1109_v42  ;;  %v2336_v33 = vpop.f32.mrf.mxu1 }
 0x22d   : > { %2444 = vpow2.f32 %v1973_v39  ;;  %v2916_v59 = vpop.f32.mrf.mxu0  ;;  %v1999_v39 = vld [vmem:[%s3025_s6 + $0x2] ss:$0 sm:$0xff]  ;;  %v1350_v41 = vadd.f32 %v2330_v62, %v2921_v34  ;;  %v1345_v55 = vadd.f32 %v2921_v34, %v1344_v57  ;;  %v1360_v45 = vadd.f32 %v2333_v21, %v2921_v34 }
 0x22e   : > { %v1998_v58 = vmul.f32 -1.442695, %v1112_v50  ;;  %v1111_v44 = vadd.f32 %v2906_v48, %v1091_v51  ;;  %2446 = vpow2.f32 %v1995_v54  ;;  %v1239_v50 = vadd.f32 %v2916_v59, %v1999_v39 }
 0x22f   : > { %v1233_v49 = vpop.f32.mrf.mxu0 }
 0x230   : > { %v1997_v61 = vmul.f32 -1.442695, %v1111_v44  ;;  %2448 = vpow2.f32 %v1998_v58  ;;  %v1234_v46 = vadd.f32 %v1999_v39, %v1233_v49 }
 0x231   : > { %v2429_v63 = vpop.eup %2428  ;;  %v2313_v4 = vpop.f32.mrf.mxu0 }
 0x232   : > { %v1138_v52 = vadd.f32 1.0, %v2429_v63  ;;  %2450 = vpow2.f32 %v1997_v61 }
 0x233   : > { %v2431_v53 = vpop.eup %2430  ;;  %2452 = vrcp.f32 %v841_v60  ;;  %v1243_v27 = vpop.f32.mrf.mxu0 }
 0x234   : > { %v2433_v0 = vpop.eup %2432  ;;  %2454 = vrcp.f32 %v1138_v52  ;;  %v1137_v48 = vadd.f32 1.0, %v2431_v53  ;;  %v1364_v60 = vpop.f32.mrf.mxu1  ;;  %v1244_v63 = vadd.f32 %v1999_v39, %v1243_v27  ;;  %v1249_v53 = vadd.f32 %v2313_v4, %v1999_v39 }
 0x235   : > { %v2435_v2 = vpop.eup %2434  ;;  %2456 = vrcp.f32 %v842_v1  ;;  %v845_v20 = vadd.f32 1.0, %v2433_v0  ;;  %v2316_v37 = vpop.f32.mrf.mxu0 }
 0x236   : > { %v2437_v6 = vpop.eup %2436  ;;  %2458 = vrcp.f32 %v1137_v48  ;;  %v1140_v7 = vadd.f32 1.0, %v2435_v2  ;;  %v1355_v48 = vadd.f32 %v2921_v34, %v1354_v31 }
 0x237   : > { %v2439_v10 = vpop.eup %2438  ;;  %2460 = vrcp.f32 %v843_v56  ;;  %v846_v25 = vadd.f32 1.0, %v2437_v6  ;;  %v1253_v51 = vpop.f32.mrf.mxu0  ;;  %v1370_v6 = vadd.f32 %v2336_v33, %v2921_v34 }
 0x238   : > { %v2441_v22 = vpop.eup %2440  ;;  %2462 = vrcp.f32 %v1140_v7  ;;  %v1139_v23 = vadd.f32 1.0, %v2439_v10  ;;  %v2339_v7 = vpop.f32.mrf.mxu1  ;;  %v1254_v21 = vadd.f32 %v1999_v39, %v1253_v51 }
 0x239   : > { %v2443_v24 = vpop.eup %2442  ;;  %2464 = vrcp.f32 %v844_v3  ;;  %v847_v30 = vadd.f32 1.0, %v2441_v22  ;;  %v2319_v56 = vpop.f32.mrf.mxu0 }
 0x23a   : > { %v2445_v28 = vpop.eup %2444  ;;  %2466 = vrcp.f32 %v1139_v23  ;;  %v1142_v29 = vadd.f32 1.0, %v2443_v24  ;;  %v1259_v24 = vadd.f32 %v2316_v37, %v1999_v39 }
 0x23b   : > { %v2447_v26 = vpop.eup %2446  ;;  %2468 = vrcp.f32 %v845_v20  ;;  %v848_v36 = vadd.f32 1.0, %v2445_v28 }
 0x23c   : > { %2470 = vrcp.f32 %v1142_v29  ;;  %v1141_v32 = vadd.f32 1.0, %v2447_v26  ;;  %v1365_v29 = vadd.f32 %v2921_v34, %v1364_v60 }
 0x23d   : > { %v2449_v35 = vpop.eup %2448  ;;  %2472 = vrcp.f32 %v846_v25  ;;  %v1263_v25 = vpop.f32.mrf.mxu0 }
 0x23e   : > { %2474 = vrcp.f32 %v1141_v32  ;;  %v1144_v38 = vadd.f32 1.0, %v2449_v35  ;;  %v1380_v32 = vadd.f32 %v2339_v7, %v2921_v34  ;;  %v1374_v35 = vpop.f32.mrf.mxu1 }
 0x23f   : > { %v2451_v40 = vpop.eup %2450  ;;  %2476 = vrcp.f32 %v847_v30 }
 0x240   : > { %v2453_v42 = vpop.eup %2452  ;;  %2478 = vrcp.f32 %v1144_v38  ;;  %v1143_v43 = vadd.f32 1.0, %v2451_v40  ;;  %v1264_v40 = vadd.f32 %v1999_v39, %v1263_v25 }
 0x241   : > { %v2455_v47 = vpop.eup %2454  ;;  %2480 = vrcp.f32 %v848_v36  ;;  %v1383_v62 = vmul.f32 %v2453_v42, %v1234_v46  ;;  %v1269_v42 = vadd.f32 %v2319_v56, %v1999_v39 }
 0x242   : > { %v2457_v54 = vpop.eup %2456  ;;  %2482 = vrcp.f32 %v1143_v43  ;;  %v1392_v44 = vmul.f32 %v2455_v47, %v1350_v41  ;;  %v1375_v47 = vadd.f32 %v2921_v34, %v1374_v35  ;;  %v2370_v34 = vpop.f32.mrf.mxu1 }
 0x243   : > { %v2459_v58 = vpop.eup %2458  ;;  %v1384_v49 = vmul.f32 %v2457_v54, %v1239_v50 }
 0x244   : > { %v2461_v61 = vpop.eup %2460  ;;  %v1391_v1 = vmul.f32 %v2459_v58, %v1345_v55  ;;  %v1626_v60 = vpop.f32.mrf.mxu1 }
 0x245   : > { %v2463_v52 = vpop.eup %2462  ;;  %v2933_v57 = vadd.f32 %v1392_v44, %v1384_v49  ;;  %v1385_v20 = vmul.f32 %v2461_v61, %v1244_v63  ;;  %v2033_v63 = vld [vmem:[%s3025_s6 + $0x4] ss:$0 sm:$0xff] }
 0x246   : > { %v2465_v0 = vpop.eup %2464  ;;  %v2930_v59 = vadd.f32 %v1391_v1, %v1383_v62  ;;  %v1394_v3 = vmul.f32 %v2463_v52, %v1360_v45  ;;  %v2373_v61 = vpop.f32.mrf.mxu1 }
 0x247   : > { %v2467_v2 = vpop.eup %2466  ;;  %v1386_v23 = vmul.f32 %v2465_v0, %v1249_v53 }
 0x248   : > { %v2469_v10 = vpop.eup %2468  ;;  %v1393_v22 = vmul.f32 %v2467_v2, %v1355_v48  ;;  %2348 = vmatprep.mubr.msk.f32.mxu0 %vm673_vm1, %v2930_v59  ;;  %v1636_v62 = vpop.f32.mrf.mxu1 }
 0x249   : > { %v2471_v4 = vpop.eup %2470  ;;  %2349 = vmatmul.mubr.msk.f32.vlgmr.msra.gmra.mxu0 %vm673_vm1, %v2933_v57  ;;  %v2943_v30 = vadd.f32 %v1394_v3, %v1386_v23  ;;  %v1387_v38 = vmul.f32 %v2469_v10, %v1254_v21 }
 0x24a   : > { %v2473_v27 = vpop.eup %2472  ;;  %v2940_v28 = vadd.f32 %v1393_v22, %v1385_v20  ;;  %v1396_v31 = vmul.f32 %v2471_v4, %v1370_v6  ;;  %v2376_v53 = vpop.f32.mrf.mxu1 }
 0x24b   : > { %v2475_v26 = vpop.eup %2474  ;;  %v1388_v33 = vmul.f32 %v2473_v27, %v1259_v24 }
 0x24c   : > { %v2477_v36 = vpop.eup %2476  ;;  %v1395_v37 = vmul.f32 %v2475_v26, %v1365_v29  ;;  %2351 = vmatprep.mubr.msk.f32.mxu0 %vm673_vm1, %v2940_v28  ;;  %v1646_v10 = vpop.f32.mrf.mxu1 }
 0x24d   : > { %v2479_v41 = vpop.eup %2478  ;;  %2352 = vmatmul.mubr.msk.f32.gmra.mxu0 %vm673_vm1, %v2943_v30  ;;  %v2953_v51 = vadd.f32 %v1396_v31, %v1388_v33  ;;  %v1389_v55 = vmul.f32 %v2477_v36, %v1264_v40 }
 0x24e   : > { %v2481_v43 = vpop.eup %2480  ;;  %v2950_v46 = vadd.f32 %v1395_v37, %v1387_v38  ;;  %v1398_v54 = vmul.f32 %v2479_v41, %v1380_v32  ;;  %v2379_v29 = vpop.f32.mrf.mxu1 }
 0x24f   : > { %v2483_v50 = vpop.eup %2482  ;;  %v1390_v44 = vmul.f32 %v2481_v43, %v1269_v42 }
 0x250   : > { %v1397_v58 = vmul.f32 %v2483_v50, %v1375_v47  ;;  %2354 = vmatprep.mubr.msk.f32.mxu0 %vm673_vm1, %v2950_v46  ;;  %v1656_v37 = vpop.f32.mrf.mxu1 }
 0x251   : > { %2355 = vmatmul.mubr.msk.f32.gmra.mxu0 %vm673_vm1, %v2953_v51  ;;  %v2961_v45 = vadd.f32 %v1398_v54, %v1390_v44 }
 0x252   : > { %v2959_v39 = vadd.f32 %v1397_v58, %v1389_v55 }
 0x254   : > { %2357 = vmatprep.mubr.msk.f32.mxu0 %vm673_vm1, %v2959_v39 }
 0x255   : > { %2358 = vmatmul.mubr.msk.f32.gmra.mxu0 %vm673_vm1, %v2961_v45 }
 0x309   : > { %v2350_v1 = vpop.f32.mrf.mxu0 }
 0x30a   : > { %v1632_v52 = vadd.f32 %v2370_v34, %v2350_v1 }
 0x30b   : > { %v1497_v49 = vpop.f32.mrf.mxu0 }
 0x30c   : > { %v1672_v56 = vadd.f32 %v2033_v63, %v1632_v52  ;;  %v1627_v0 = vadd.f32 %v1626_v60, %v1497_v49 }
 0x30d   : > { %v2353_v48 = vpop.f32.mrf.mxu0 }
 0x30e   : > { %v2035_v2 = vmul.f32 -1.442695, %v1672_v56  ;;  %v1671_v3 = vadd.f32 %v2033_v63, %v1627_v0  ;;  %v1642_v6 = vadd.f32 %v2373_v61, %v2353_v48 }
 0x30f   : > { %v1507_v7 = vpop.f32.mrf.mxu0 }
 0x310   : > { %2484 = vpow2.f32 %v2035_v2  ;;  %v2034_v20 = vmul.f32 -1.442695, %v1671_v3  ;;  %v1674_v21 = vadd.f32 %v2033_v63, %v1642_v6  ;;  %v1637_v22 = vadd.f32 %v1636_v62, %v1507_v7 }
 0x311   : > { %v2356_v4 = vpop.f32.mrf.mxu0 }
 0x312   : > { %2486 = vpow2.f32 %v2034_v20  ;;  %v2037_v23 = vmul.f32 -1.442695, %v1674_v21  ;;  %v1673_v24 = vadd.f32 %v2033_v63, %v1637_v22  ;;  %v1652_v25 = vadd.f32 %v2376_v53, %v2356_v4 }
 0x313   : > { %2488 = vtanh.f32 %v2062_v8  ;;  %v1517_v27 = vpop.f32.mrf.mxu0 }
 0x314   : > { %2490 = vpow2.f32 %v2037_v23  ;;  %v2036_v26 = vmul.f32 -1.442695, %v1673_v24  ;;  %v1676_v31 = vadd.f32 %v2033_v63, %v1652_v25  ;;  %v1647_v32 = vadd.f32 %v1646_v10, %v1517_v27 }
 0x315   : > { %2492 = vtanh.f32 %v2063_v9  ;;  %v2359_v35 = vpop.f32.mrf.mxu0 }
 0x316   : > { %2494 = vpow2.f32 %v2036_v26  ;;  %v2039_v36 = vmul.f32 -1.442695, %v1676_v31  ;;  %v1675_v38 = vadd.f32 %v2033_v63, %v1647_v32  ;;  %v1662_v40 = vadd.f32 %v2379_v29, %v2359_v35 }
 0x317   : > { %2496 = vtanh.f32 %v2066_v12  ;;  %v1527_v41 = vpop.f32.mrf.mxu0 }
 0x318   : > { %2498 = vpow2.f32 %v2039_v36  ;;  %v2038_v8 = vmul.f32 -1.442695, %v1675_v38  ;;  %v1678_v33 = vadd.f32 %v2033_v63, %v1662_v40  ;;  %v1657_v42 = vadd.f32 %v1656_v37, %v1527_v41 }
 0x319   : > { %2500 = vtanh.f32 %v2067_v13 }
 0x31a   : > { %2502 = vpow2.f32 %v2038_v8  ;;  %v2041_v5 = vmul.f32 -1.442695, %v1678_v33  ;;  %v1677_v9 = vadd.f32 %v2033_v63, %v1657_v42 }
 0x31b   : > { %2504 = vtanh.f32 %v2070_v15 }
 0x31c   : > { %2506 = vpow2.f32 %v2041_v5  ;;  %v2040_v43 = vmul.f32 -1.442695, %v1677_v9 }
 0x31d   : > { %v2485_v47 = vpop.eup %2484  ;;  %2508 = vtanh.f32 %v2071_v16 }
 0x31e   : > { %v1704_v12 = vadd.f32 1.0, %v2485_v47  ;;  %2510 = vpow2.f32 %v2040_v43 }
 0x31f   : > { %v2487_v50 = vpop.eup %2486  ;;  %2512 = vtanh.f32 %v2075_v19 }
 0x320   : > { %v2489_v11 = vpop.eup %2488  ;;  %2514 = vrcp.f32 %v1704_v12  ;;  %v1703_v13 = vadd.f32 1.0, %v2487_v50 }
 0x321   : > { %v2491_v54 = vpop.eup %2490  ;;  %2516 = vtanh.f32 %v2933_v57 }
 0x322   : > { %v2493_v55 = vpop.eup %2492  ;;  %2518 = vrcp.f32 %v1703_v13  ;;  %v1706_v15 = vadd.f32 1.0, %v2491_v54 }
 0x323   : > { %v2495_v58 = vpop.eup %2494  ;;  %2520 = vtanh.f32 %v2930_v59 }
 0x324   : > { %v2497_v14 = vpop.eup %2496  ;;  %2522 = vrcp.f32 %v1706_v15  ;;  %v1705_v16 = vadd.f32 1.0, %v2495_v58 }
 0x325   : > { %v2499_v44 = vpop.eup %2498  ;;  %2524 = vtanh.f32 %v2943_v30 }
 0x326   : > { %v2501_v34 = vpop.eup %2500  ;;  %2526 = vrcp.f32 %v1705_v16  ;;  %v1708_v19 = vadd.f32 1.0, %v2499_v44 }
 0x327   : > { %v2503_v60 = vpop.eup %2502  ;;  %2528 = vtanh.f32 %v2940_v28 }
 0x328   : > { %v2505_v61 = vpop.eup %2504  ;;  %2530 = vrcp.f32 %v1708_v19  ;;  %v1707_v57 = vadd.f32 1.0, %v2503_v60 }
 0x329   : > { %v2507_v62 = vpop.eup %2506  ;;  %2532 = vtanh.f32 %v2953_v51 }
 0x32a   : > { %v2509_v63 = vpop.eup %2508  ;;  %2534 = vrcp.f32 %v1707_v57  ;;  %v1710_v59 = vadd.f32 1.0, %v2507_v62 }
 0x32b   : > { %v2511_v1 = vpop.eup %2510  ;;  %2536 = vtanh.f32 %v2950_v46 }
 0x32c   : > { %v2513_v52 = vpop.eup %2512  ;;  %2538 = vrcp.f32 %v1710_v59  ;;  %v1709_v30 = vadd.f32 1.0, %v2511_v1 }
 0x32d   : > { %v2515_v49 = vpop.eup %2514  ;;  %2540 = vtanh.f32 %v2961_v45 }
 0x32e   : > { %v2517_v53 = vpop.eup %2516  ;;  %v1744_v28 = vsub.f32 1.0, %v2515_v49  ;;  %2542 = vrcp.f32 %v1709_v30  ;;  %v1736_v0 = vmul.f32 %v2515_v49, %v2493_v55 }
 0x32f   : > { %v2519_v56 = vpop.eup %2518  ;;  %2544 = vtanh.f32 %v2074_v18 }
 0x330   : > { %v2521_v51 = vpop.eup %2520  ;;  %v1760_v48 = vmul.f32 %v2517_v53, %v1744_v28  ;;  %v1743_v2 = vsub.f32 1.0, %v2519_v56  ;;  %2546 = vtanh.f32 %v2959_v39  ;;  %v1735_v7 = vmul.f32 %v2519_v56, %v2489_v11 }
 0x331   : > { %v2523_v3 = vpop.eup %2522 }
 0x332   : > { %v2525_v46 = vpop.eup %2524  ;;  %v1768_v6 = vadd.f32 %v1760_v48, %v1736_v0  ;;  %v1759_v10 = vmul.f32 %v2521_v51, %v1743_v2  ;;  %v1746_v45 = vsub.f32 1.0, %v2523_v3  ;;  %v1738_v22 = vmul.f32 %v2523_v3, %v2501_v34 }
 0x333   : > { %v2527_v20 = vpop.eup %2526 }
 0x334   : > { %v2529_v17 = vpop.eup %2528  ;;  %v2053_v18 = vpack.c.bf16 %v1768_v6, %v1768_v6  ;;  %v1767_v21 = vadd.f32 %v1759_v10, %v1735_v7  ;;  %v1762_v4 = vmul.f32 %v2525_v46, %v1746_v45  ;;  %v1745_v23 = vsub.f32 1.0, %v2527_v20 }
 0x335   : > { %v2531_v39 = vpop.eup %2530  ;;  %v1737_v31 = vmul.f32 %v2527_v20, %v2497_v14 }
 0x336   : > { %v2533_v24 = vpop.eup %2532  ;;  %1809 = vst.msk [vmem:[%s2998_s22 + $0x4] sm:$0xf] %vm1807_vm2, %v2053_v18  ;;  %v2052_v25 = vpack.c.bf16 %v1767_v21, %v1767_v21  ;;  %v1770_v27 = vadd.f32 %v1762_v4, %v1738_v22  ;;  %v1748_v29 = vsub.f32 1.0, %v2531_v39  ;;  %v1761_v32 = vmul.f32 %v2529_v17, %v1745_v23 }
 0x337   : > { %v2535_v26 = vpop.eup %2534  ;;  %v1740_v38 = vmul.f32 %v2531_v39, %v2509_v63 }
 0x338   : > { %v2537_v35 = vpop.eup %2536  ;;  %1808 = vst.msk [vmem:[%s2998_s22] sm:$0xf] %vm1807_vm2, %v2052_v25  ;;  %v2055_v36 = vpack.c.bf16 %v1770_v27, %v1770_v27  ;;  %v1764_v40 = vmul.f32 %v2533_v24, %v1748_v29  ;;  %v1747_v37 = vsub.f32 1.0, %v2535_v26  ;;  %v1769_v8 = vadd.f32 %v1761_v32, %v1737_v31 }
 0x339   : > { %v2539_v41 = vpop.eup %2538  ;;  %v1739_v5 = vmul.f32 %v2535_v26, %v2505_v61 }
 0x33a   : > { %v2541_v33 = vpop.eup %2540  ;;  %1811 = vst.msk [vmem:[%s2998_s22 + $0xc] sm:$0xf] %vm1807_vm2, %v2055_v36  ;;  %v1772_v42 = vadd.f32 %v1764_v40, %v1740_v38  ;;  %v1763_v9 = vmul.f32 %v2537_v35, %v1747_v37  ;;  %v1750_v43 = vsub.f32 1.0, %v2539_v41  ;;  %v2054_v12 = vpack.c.bf16 %v1769_v8, %v1769_v8 }
 0x33b   : > { %v2543_v47 = vpop.eup %2542  ;;  %v1742_v54 = vmul.f32 %v2539_v41, %v2513_v52 }
 0x33c   : > { %v2545_v50 = vpop.eup %2544  ;;  %v2057_v11 = vpack.c.bf16 %v1772_v42, %v1772_v42  ;;  %v1771_v13 = vadd.f32 %v1763_v9, %v1739_v5  ;;  %v1766_v55 = vmul.f32 %v2541_v33, %v1750_v43  ;;  %1810 = vst.msk [vmem:[%s2998_s22 + $0x8] sm:$0xf] %vm1807_vm2, %v2054_v12  ;;  %v1749_v15 = vsub.f32 1.0, %v2543_v47 }
 0x33d   : > { %v2547_v58 = vpop.eup %2546  ;;  %v1741_v44 = vmul.f32 %v2545_v50, %v2543_v47 }
 0x33e   : > { %1813 = vst.msk [vmem:[%s2998_s22 + $0x14] sm:$0xf] %vm1807_vm2, %v2057_v11  ;;  %v2056_v14 = vpack.c.bf16 %v1771_v13, %v1771_v13  ;;  %v1774_v16 = vadd.f32 %v1766_v55, %v1742_v54  ;;  %v1765_v34 = vmul.f32 %v2547_v58, %v1749_v15 }
 0x340   : > { %1812 = vst.msk [vmem:[%s2998_s22 + $0x10] sm:$0xf] %vm1807_vm2, %v2056_v14  ;;  %v2059_v19 = vpack.c.bf16 %v1774_v16, %v1774_v16  ;;  %v1773_v60 = vadd.f32 %v1765_v34, %v1741_v44 }
 0x342   : > { %1815 = vst.msk [vmem:[%s2998_s22 + $0x1c] sm:$0xf] %vm1807_vm2, %v2059_v19  ;;  %v2058_v61 = vpack.c.bf16 %v1773_v60, %v1773_v60 }
 0x344   : > { %1814 = vst.msk [vmem:[%s2998_s22 + $0x18] sm:$0xf] %vm1807_vm2, %v2058_v61 }
 0x345 PF: > { %s17_s24 = sadd.s32 1, %s2554_s24  }
 0x346   : > { %p14_p4 = scmp.ge.s32.totalorder %s17_s24, 4  }
 0x348   :  { %16 = sbr.rel (!%p14_p4) target bundleno = 1 (0x1), region = 97 }

</bundles_post_ra>
